<compile_context>
chip_gen: v5e
topology: v5e:2x2
jax: 0.10.0
libtpu: 0.0.40
codegen_flags: <defaults>
</compile_context>

<pallas_src>
import functools
import math

import jax
import jax.numpy as jnp
from jax.experimental import pallas as pl
from jax.experimental.pallas import tpu as pltpu


def _layernorm(x, alpha, bias, eps=1e-6):
    # Matches PyTorch LayerNormalization: unbiased std (N-1), divides by (std + eps).
    d = x.shape[-1]
    mean = jnp.mean(x, axis=-1, keepdims=True)
    diff = x - mean
    var = jnp.sum(diff * diff, axis=-1, keepdims=True) * (1.0 / (d - 1))
    std = jnp.sqrt(var)
    return alpha * diff / (std + eps) + bias          # exact divide (correctness)


def encoder_block_kernel(h, d_k, tq, ff_chunk,
                         lens_ref,                        # SMEM [B] int32 (scalar prefetch)
                         xf_ref,                          # [1,S,D] f32 (full sequence)
                         wq_ref, wk_ref, wv_ref, wo_ref,  # [D,D] f32 each (wq pre-scaled)
                         w1_ref, b1_ref, w2_ref, b2_ref,  # [D,dff], [1,dff], [dff,D], [1,D] f32
                         a1_ref, c1_ref, a2_ref, c2_ref,  # [1,D] f32 each
                         o_ref,                           # [1,TQ,D] f32
                         k_scr, v_scr):                   # VMEM [S,D] f32 scratch (per-row K/V)
    b = pl.program_id(0)
    qi = pl.program_id(1)
    length = lens_ref[b]

    S = xf_ref.shape[1]
    a1 = a1_ref[...]
    c1 = c1_ref[...]

    # ---- K/V path: compute once per batch row, reuse for every query tile ----
    @pl.when(qi == 0)
    def _():
        x_full = xf_ref[0]                                # [S, D]
        y_full = _layernorm(x_full, a1, c1)               # [S, D]
        k_scr[...] = jnp.dot(y_full, wk_ref[...], preferred_element_type=jnp.float32)
        v_scr[...] = jnp.dot(y_full, wv_ref[...], preferred_element_type=jnp.float32)

    # ---- query tile (sliced from the resident full-sequence block) ----
    x_q = xf_ref[0, pl.ds(qi * tq, tq), :]                # [TQ, D]
    y_q = _layernorm(x_q, a1, c1)
    # 1/sqrt(d_k) is folded into wq on the host.
    q_all = jnp.dot(y_q, wq_ref[...], preferred_element_type=jnp.float32)   # [TQ, D]

    # Additive key-padding mask built from per-row length (no [S,S] mask DMA).
    key_idx = jax.lax.broadcasted_iota(jnp.int32, (tq, S), 1)
    key_mask = key_idx < length

    acc = x_q                                             # residual carried in f32
    # Static head loop (h is small); TODO(synk): switch to lax.fori_loop for large h.
    for hd in range(h):
        lo = hd * d_k
        q_h = q_all[:, lo:lo + d_k]                       # [TQ, dk]
        k_h = k_scr[:, lo:lo + d_k]                       # [S, dk]
        v_h = v_scr[:, lo:lo + d_k]                       # [S, dk]

        # Contract last dims of both operands: no explicit K transpose.
        s = jax.lax.dot_general(q_h, k_h,
                                dimension_numbers=(((1,), (1,)), ((), ())),
                                preferred_element_type=jnp.float32)          # [TQ, S]
        s = jnp.where(key_mask, s, -1e9)
        s = s - jnp.max(s, axis=-1, keepdims=True)
        p = jnp.exp(s)
        denom = jnp.sum(p, axis=-1, keepdims=True)
        p = p * pl.reciprocal(denom, approx=True)         # approx only in softmax

        ctx = jnp.dot(p, v_h, preferred_element_type=jnp.float32)           # [TQ, dk]
        # Accumulate the output projection per head (no concatenate).
        acc = acc + jnp.dot(ctx, wo_ref[lo:lo + d_k, :],
                            preferred_element_type=jnp.float32)             # [TQ, D]

    # ---- residual connection 1: x1 + FFN(LayerNorm(x1)) ----
    y2 = _layernorm(acc, a2_ref[...], c2_ref[...])

    out = acc + b2_ref[...]                               # residual + final bias (added once)
    d_ff = w1_ref.shape[1]
    for c0 in range(0, d_ff, ff_chunk):                   # stream the FFN hidden in chunks
        w1_c = w1_ref[:, c0:c0 + ff_chunk]                # [D, C]
        b1_c = b1_ref[:, c0:c0 + ff_chunk]                # [1, C]
        h1 = jnp.dot(y2, w1_c, preferred_element_type=jnp.float32) + b1_c
        h1 = jnp.maximum(h1, 0.0)                         # ReLU
        w2_c = w2_ref[c0:c0 + ff_chunk, :]                # [C, D]
        out = out + jnp.dot(h1, w2_c, preferred_element_type=jnp.float32)

    o_ref[0] = out


def _pick_tq(S, cap):
    if S <= cap:
        return S
    best = None
    for t in range(128, cap + 1, 128):                    # prefer MXU-friendly multiples of 128
        if S % t == 0:
            best = t
    if best is not None:
        return best
    for t in range(8, cap + 1, 8):
        if S % t == 0:
            best = t
    return best if best is not None else S


def _pick_ff_chunk(d_ff, cap=512):
    if d_ff <= cap:
        return d_ff
    for c in (512, 384, 256, 128):
        if d_ff % c == 0:
            return c
    return d_ff


def _vmem_footprint_bytes(S, D, d_ff, tq, ff_chunk):
    """Explicit VMEM footprint estimate (f32 everywhere, weights single-buffered)."""
    f32 = 4
    weights = (4 * D * D + D * d_ff + d_ff + d_ff * D + 5 * D) * f32   # Buffered(1)
    x_block = 2 * S * D * f32                       # full-seq input, double-buffered over b
    out_block = 2 * tq * D * f32                    # output tile, double-buffered
    kv_scratch = 2 * S * D * f32                    # K/V carry
    transients = (3 * tq * S + 6 * tq * D + 2 * S * D + 2 * tq * ff_chunk) * f32
    return weights + x_block + out_block + kv_scratch + transients


def encoder_block(x, lengths, params, *, h):
    """x: [B,S,D] f32, lengths: [B] int32 key-padding lengths."""
    B, S, D = x.shape
    assert D % h == 0
    d_k = D // h
    d_ff = params["w1"].shape[1]

    # Per-generation VMEM capacity (falls back gracefully off-TPU / in interpret).
    try:
        vmem_cap = int(pltpu.get_tpu_info().vmem_capacity_bytes)
    except Exception:
        vmem_cap = 64 * 1024 * 1024

    tq_cap = 512 if vmem_cap >= (100 << 20) else 256      # bigger tiles on v5e/v6e (128 MiB)
    tq = _pick_tq(S, tq_cap)
    nq = S // tq
    ff_chunk = _pick_ff_chunk(d_ff)

    footprint = _vmem_footprint_bytes(S, D, d_ff, tq, ff_chunk)
    vmem_limit = int(footprint * 1.25) + (4 << 20)
    vmem_limit = max(32 << 20, min(vmem_limit, int(vmem_cap * 0.9)))

    # Host-side weight prep: fold 1/sqrt(d_k) into Wq (removes a [TQ,S] multiply per head).
    scale = 1.0 / math.sqrt(d_k)
    wq_s = (params["wq"] * scale).astype(jnp.float32)

    def _const_spec(shape):
        # Grid-constant operand: single-buffer (double-buffering buys nothing here).
        return pl.BlockSpec(shape, lambda b, q, lens: (0,) * len(shape),
                            pipeline_mode=pl.Buffered(1))

    kernel = functools.partial(encoder_block_kernel, h, d_k, tq, ff_chunk)

    return pl.pallas_call(
        kernel,
        out_shape=jax.ShapeDtypeStruct((B, S, D), jnp.float32),
        grid_spec=pltpu.PrefetchScalarGridSpec(
            num_scalar_prefetch=1,
            grid=(B, nq),
            in_specs=[
                pl.BlockSpec((1, S, D), lambda b, q, lens: (b, 0, 0)),   # x (full seq)
                _const_spec((D, D)),                                     # wq (pre-scaled)
                _const_spec((D, D)),                                     # wk
                _const_spec((D, D)),                                     # wv
                _const_spec((D, D)),                                     # wo
                _const_spec((D, d_ff)),                                  # w1
                _const_spec((1, d_ff)),                                  # b1
                _const_spec((d_ff, D)),                                  # w2
                _const_spec((1, D)),                                     # b2
                _const_spec((1, D)),                                     # alpha1
                _const_spec((1, D)),                                     # bias1
                _const_spec((1, D)),                                     # alpha2
                _const_spec((1, D)),                                     # bias2
            ],
            out_specs=pl.BlockSpec((1, tq, D), lambda b, q, lens: (b, q, 0)),
            scratch_shapes=[
                pltpu.VMEM((S, D), jnp.float32),   # K = LN(x) @ Wk, carried across q tiles
                pltpu.VMEM((S, D), jnp.float32),   # V = LN(x) @ Wv
            ],
        ),
        compiler_params=pltpu.CompilerParams(
            # q axis must be "arbitrary": it carries the K/V scratch for a batch row.
            dimension_semantics=("parallel", "arbitrary"),
            vmem_limit_bytes=int(vmem_limit)),
    )(lengths, x,
      wq_s, params["wk"], params["wv"], params["wo"],
      params["w1"], params["b1"], params["w2"], params["b2"],
      params["a1"], params["c1"], params["a2"], params["c2"])


def encoder_block_ref(x, lengths, params, *, h):
    # Pure-JAX f32 reference mirroring the PyTorch forward (dropout = identity).
    B, S, D = x.shape
    d_k = D // h

    def ln(x, a, c, eps=1e-6):
        mean = jnp.mean(x, axis=-1, keepdims=True)
        diff = x - mean
        var = jnp.sum(diff * diff, axis=-1, keepdims=True) / (D - 1)
        return a * diff / (jnp.sqrt(var) + eps) + c

    col = jnp.arange(S, dtype=jnp.int32)
    mask = (col[None, :] < lengths[:, None]).astype(jnp.int32)          # [B,S]
    mask = jnp.broadcast_to(mask[:, None, :], (B, S, S))                # [B,S,S]

    y = ln(x, params["a1"], params["c1"])
    q = y @ params["wq"]
    k = y @ params["wk"]
    v = y @ params["wv"]
    q = q.reshape(B, S, h, d_k).transpose(0, 2, 1, 3)
    k = k.reshape(B, S, h, d_k).transpose(0, 2, 1, 3)
    v = v.reshape(B, S, h, d_k).transpose(0, 2, 1, 3)
    scores = jnp.einsum("bhqd,bhkd->bhqk", q, k) / math.sqrt(d_k)
    scores = jnp.where(mask[:, None, :, :] == 0, -1e9, scores)
    p = jax.nn.softmax(scores, axis=-1)
    attn = jnp.einsum("bhqk,bhkd->bhqd", p, v).transpose(0, 2, 1, 3).reshape(B, S, D)
    x1 = x + attn @ params["wo"]
    y2 = ln(x1, params["a2"], params["c2"])
    ff = jnp.maximum(y2 @ params["w1"] + params["b1"], 0.0) @ params["w2"] + params["b2"]
    return x1 + ff


if __name__ == "__main__":
    B, S, D, H, D_FF = 2, 8, 32, 4, 64

    key = jax.random.PRNGKey(0)
    keys = jax.random.split(key, 16)

    def rnd(k, shape, scale=0.1):
        return jax.random.normal(k, shape, dtype=jnp.float32) * scale

    params = {
        "wq": rnd(keys[0], (D, D)),
        "wk": rnd(keys[1], (D, D)),
        "wv": rnd(keys[2], (D, D)),
        "wo": rnd(keys[3], (D, D)),
        "w1": rnd(keys[4], (D, D_FF)),
        "b1": rnd(keys[5], (1, D_FF)),
        "w2": rnd(keys[6], (D_FF, D)),
        "b2": rnd(keys[7], (1, D)),
        "a1": jnp.ones((1, D), jnp.float32),
        "c1": jnp.zeros((1, D), jnp.float32),
        "a2": jnp.ones((1, D), jnp.float32),
        "c2": jnp.zeros((1, D), jnp.float32),
    }

    x = rnd(keys[8], (B, S, D), scale=1.0)

    # padding-style src mask: batch 0 attends to all 8 tokens, batch 1 to first 6
    lengths = jnp.array([8, 6], dtype=jnp.int32)

    out = encoder_block(x, lengths, params, h=H)
    out = jax.block_until_ready(out)

    ref = encoder_block_ref(x, lengths, params, h=H)
    assert out.shape == (B, S, D)
    # f32 matmuls; only the softmax denominator uses the approximate reciprocal.
    assert jnp.allclose(out, ref, rtol=2e-3, atol=2e-3), "mismatch vs reference"

    print("KERNEL_OK")
</pallas_src>

<mosaic_0001>
module attributes {stable_mosaic.version = 11 : i64} {
  func.func @encoder_block_kernel(%arg0: i32, %arg1: i32, %arg2: memref<2xi32, #tpu.memory_space<smem>>, %arg3: memref<1x8x32xf32, #tpu.memory_space<vmem>>, %arg4: memref<32x32xf32, #tpu.memory_space<vmem>>, %arg5: memref<32x32xf32, #tpu.memory_space<vmem>>, %arg6: memref<32x32xf32, #tpu.memory_space<vmem>>, %arg7: memref<32x32xf32, #tpu.memory_space<vmem>>, %arg8: memref<32x64xf32, #tpu.memory_space<vmem>>, %arg9: memref<1x64xf32, #tpu.memory_space<vmem>>, %arg10: memref<64x32xf32, #tpu.memory_space<vmem>>, %arg11: memref<1x32xf32, #tpu.memory_space<vmem>>, %arg12: memref<1x32xf32, #tpu.memory_space<vmem>>, %arg13: memref<1x32xf32, #tpu.memory_space<vmem>>, %arg14: memref<1x32xf32, #tpu.memory_space<vmem>>, %arg15: memref<1x32xf32, #tpu.memory_space<vmem>>, %arg16: memref<1x8x32xf32, #tpu.memory_space<vmem>>, %arg17: memref<8x32xf32, #tpu.memory_space<vmem>>, %arg18: memref<8x32xf32, #tpu.memory_space<vmem>>) attributes {dimension_semantics = [#tpu.dimension_semantics<parallel>, #tpu.dimension_semantics<arbitrary>], iteration_bounds = array<i64: 2, 1>, scalar_prefetch = 1 : i64, scratch_operands = 2 : i64, tpu.core_type = #tpu.core_type<tc>, window_params = [{transform_indices = @transform_0, window_bounds = array<i64: 1, 8, 32>}, {pipeline_mode = #tpu.pipeline_mode<synchronous>, transform_indices = @transform_1, window_bounds = array<i64: 32, 32>}, {pipeline_mode = #tpu.pipeline_mode<synchronous>, transform_indices = @transform_2, window_bounds = array<i64: 32, 32>}, {pipeline_mode = #tpu.pipeline_mode<synchronous>, transform_indices = @transform_3, window_bounds = array<i64: 32, 32>}, {pipeline_mode = #tpu.pipeline_mode<synchronous>, transform_indices = @transform_4, window_bounds = array<i64: 32, 32>}, {pipeline_mode = #tpu.pipeline_mode<synchronous>, transform_indices = @transform_5, window_bounds = array<i64: 32, 64>}, {pipeline_mode = #tpu.pipeline_mode<synchronous>, transform_indices = @transform_6, window_bounds = array<i64: 1, 64>}, {pipeline_mode = #tpu.pipeline_mode<synchronous>, transform_indices = @transform_7, window_bounds = array<i64: 64, 32>}, {pipeline_mode = #tpu.pipeline_mode<synchronous>, transform_indices = @transform_8, window_bounds = array<i64: 1, 32>}, {pipeline_mode = #tpu.pipeline_mode<synchronous>, transform_indices = @transform_9, window_bounds = array<i64: 1, 32>}, {pipeline_mode = #tpu.pipeline_mode<synchronous>, transform_indices = @transform_10, window_bounds = array<i64: 1, 32>}, {pipeline_mode = #tpu.pipeline_mode<synchronous>, transform_indices = @transform_11, window_bounds = array<i64: 1, 32>}, {pipeline_mode = #tpu.pipeline_mode<synchronous>, transform_indices = @transform_12, window_bounds = array<i64: 1, 32>}, {transform_indices = @transform_13, window_bounds = array<i64: 1, 8, 32>}]} {
    %0 = arith.index_cast %arg0 : i32 to index
    %1 = memref.load %arg2[%0] : memref<2xi32, #tpu.memory_space<smem>>
    %c0 = arith.constant 0 : index
    %c0_0 = arith.constant 0 : index
    %2 = vector.load %arg12[%c0, %c0_0] : memref<1x32xf32, #tpu.memory_space<vmem>>, vector<1x32xf32>
    %c0_1 = arith.constant 0 : index
    %c0_2 = arith.constant 0 : index
    %3 = vector.load %arg13[%c0_1, %c0_2] : memref<1x32xf32, #tpu.memory_space<vmem>>, vector<1x32xf32>
    %c0_i32 = arith.constant 0 : i32
    %4 = arith.cmpi eq, %arg1, %c0_i32 : i32
    %5 = arith.extui %4 : i1 to i32
    %c0_i32_3 = arith.constant 0 : i32
    %6 = arith.cmpi ne, %5, %c0_i32_3 : i32
    scf.if %6 {
      %c0_81 = arith.constant 0 : index
      %c0_82 = arith.constant 0 : index
      %c0_83 = arith.constant 0 : index
      %154 = vector.load %arg3[%c0_81, %c0_82, %c0_83] : memref<1x8x32xf32, #tpu.memory_space<vmem>>, vector<1x8x32xf32>
      %155 = vector.shape_cast %154 : vector<1x8x32xf32> to vector<8x32xf32>
      %cst_84 = arith.constant dense<0.000000e+00> : vector<8xf32>
      %156 = vector.multi_reduction <add>, %155, %cst_84 [1] : vector<8x32xf32> to vector<8xf32>
      %157 = vector.shape_cast %156 : vector<8xf32> to vector<8x1xf32>
      %cst_85 = arith.constant 3.200000e+01 : f32
      %158 = vector.broadcast %cst_85 : f32 to vector<8x1xf32>
      %159 = arith.divf %157, %158 : vector<8x1xf32>
      %160 = vector.broadcast %159 : vector<8x1xf32> to vector<8x32xf32>
      %161 = arith.subf %155, %160 : vector<8x32xf32>
      %162 = arith.mulf %161, %161 : vector<8x32xf32>
      %cst_86 = arith.constant dense<0.000000e+00> : vector<8xf32>
      %163 = vector.multi_reduction <add>, %162, %cst_86 [1] : vector<8x32xf32> to vector<8xf32>
      %164 = vector.shape_cast %163 : vector<8xf32> to vector<8x1xf32>
      %cst_87 = arith.constant 0.0322580636 : f32
      %165 = vector.broadcast %cst_87 : f32 to vector<8x1xf32>
      %166 = arith.mulf %164, %165 : vector<8x1xf32>
      %167 = math.sqrt %166 : vector<8x1xf32>
      %168 = vector.broadcast %2 : vector<1x32xf32> to vector<8x32xf32>
      %169 = arith.mulf %168, %161 : vector<8x32xf32>
      %cst_88 = arith.constant 9.99999997E-7 : f32
      %170 = vector.broadcast %cst_88 : f32 to vector<8x1xf32>
      %171 = arith.addf %167, %170 : vector<8x1xf32>
      %172 = vector.broadcast %171 : vector<8x1xf32> to vector<8x32xf32>
      %173 = arith.divf %169, %172 : vector<8x32xf32>
      %174 = vector.broadcast %3 : vector<1x32xf32> to vector<8x32xf32>
      %175 = arith.addf %173, %174 : vector<8x32xf32>
      %c0_89 = arith.constant 0 : index
      %c0_90 = arith.constant 0 : index
      %176 = vector.load %arg5[%c0_89, %c0_90] : memref<32x32xf32, #tpu.memory_space<vmem>>, vector<32x32xf32>
      %cst_91 = arith.constant dense<0.000000e+00> : vector<8x32xf32>
      %177 = tpu.matmul %175, %176, %cst_91 {dimension_numbers = #tpu.dot_dimension_numbers<[1], [0], [0], [1], [0, 0, 1, 1], [], []>} : vector<8x32xf32>, vector<32x32xf32>, vector<8x32xf32> -> vector<8x32xf32>
      %c0_92 = arith.constant 0 : index
      %c0_93 = arith.constant 0 : index
      %178 = vector.load %arg17[%c0_92, %c0_93] : memref<8x32xf32, #tpu.memory_space<vmem>>, vector<8x32xf32>
      tpu.vector_store %arg17[%c0_92, %c0_93], %177 {strides = array<i32>} : memref<8x32xf32, #tpu.memory_space<vmem>>, vector<8x32xf32>,
      %c0_94 = arith.constant 0 : index
      %c0_95 = arith.constant 0 : index
      %179 = vector.load %arg6[%c0_94, %c0_95] : memref<32x32xf32, #tpu.memory_space<vmem>>, vector<32x32xf32>
      %cst_96 = arith.constant dense<0.000000e+00> : vector<8x32xf32>
      %180 = tpu.matmul %175, %179, %cst_96 {dimension_numbers = #tpu.dot_dimension_numbers<[1], [0], [0], [1], [0, 0, 1, 1], [], []>} : vector<8x32xf32>, vector<32x32xf32>, vector<8x32xf32> -> vector<8x32xf32>
      %c0_97 = arith.constant 0 : index
      %c0_98 = arith.constant 0 : index
      %181 = vector.load %arg18[%c0_97, %c0_98] : memref<8x32xf32, #tpu.memory_space<vmem>>, vector<8x32xf32>
      tpu.vector_store %arg18[%c0_97, %c0_98], %180 {strides = array<i32>} : memref<8x32xf32, #tpu.memory_space<vmem>>, vector<8x32xf32>,
    } else {
    }
    %c8_i32 = arith.constant 8 : i32
    %7 = arith.muli %arg1, %c8_i32 : i32
    %c0_4 = arith.constant 0 : index
    %8 = arith.index_cast %7 : i32 to index
    %c0_5 = arith.constant 0 : index
    %9 = vector.load %arg3[%c0_4, %8, %c0_5] : memref<1x8x32xf32, #tpu.memory_space<vmem>>, vector<1x8x32xf32>
    %10 = vector.shape_cast %9 : vector<1x8x32xf32> to vector<8x32xf32>
    %cst = arith.constant dense<0.000000e+00> : vector<8xf32>
    %11 = vector.multi_reduction <add>, %10, %cst [1] : vector<8x32xf32> to vector<8xf32>
    %12 = vector.shape_cast %11 : vector<8xf32> to vector<8x1xf32>
    %cst_6 = arith.constant 3.200000e+01 : f32
    %13 = vector.broadcast %cst_6 : f32 to vector<8x1xf32>
    %14 = arith.divf %12, %13 : vector<8x1xf32>
    %15 = vector.broadcast %14 : vector<8x1xf32> to vector<8x32xf32>
    %16 = arith.subf %10, %15 : vector<8x32xf32>
    %17 = arith.mulf %16, %16 : vector<8x32xf32>
    %cst_7 = arith.constant dense<0.000000e+00> : vector<8xf32>
    %18 = vector.multi_reduction <add>, %17, %cst_7 [1] : vector<8x32xf32> to vector<8xf32>
    %19 = vector.shape_cast %18 : vector<8xf32> to vector<8x1xf32>
    %cst_8 = arith.constant 0.0322580636 : f32
    %20 = vector.broadcast %cst_8 : f32 to vector<8x1xf32>
    %21 = arith.mulf %19, %20 : vector<8x1xf32>
    %22 = math.sqrt %21 : vector<8x1xf32>
    %23 = vector.broadcast %2 : vector<1x32xf32> to vector<8x32xf32>
    %24 = arith.mulf %23, %16 : vector<8x32xf32>
    %cst_9 = arith.constant 9.99999997E-7 : f32
    %25 = vector.broadcast %cst_9 : f32 to vector<8x1xf32>
    %26 = arith.addf %22, %25 : vector<8x1xf32>
    %27 = vector.broadcast %26 : vector<8x1xf32> to vector<8x32xf32>
    %28 = arith.divf %24, %27 : vector<8x32xf32>
    %29 = vector.broadcast %3 : vector<1x32xf32> to vector<8x32xf32>
    %30 = arith.addf %28, %29 : vector<8x32xf32>
    %c0_10 = arith.constant 0 : index
    %c0_11 = arith.constant 0 : index
    %31 = vector.load %arg4[%c0_10, %c0_11] : memref<32x32xf32, #tpu.memory_space<vmem>>, vector<32x32xf32>
    %cst_12 = arith.constant dense<0.000000e+00> : vector<8x32xf32>
    %32 = tpu.matmul %30, %31, %cst_12 {dimension_numbers = #tpu.dot_dimension_numbers<[1], [0], [0], [1], [0, 0, 1, 1], [], []>} : vector<8x32xf32>, vector<32x32xf32>, vector<8x32xf32> -> vector<8x32xf32>
    %33 = tpu.iota {dimensions = array<i32: 1>} : vector<8x8xi32>
    %34 = vector.broadcast %1 : i32 to vector<8x8xi32>
    %35 = arith.cmpi slt, %33, %34 : vector<8x8xi32>
    %36 = vector.extract_strided_slice %32 {offsets = [0, 0], sizes = [8, 8], strides = [1, 1]} : vector<8x32xf32> to vector<8x8xf32>
    %c0_13 = arith.constant 0 : index
    %c0_14 = arith.constant 0 : index
    %37 = vector.load %arg17[%c0_13, %c0_14] : memref<8x32xf32, #tpu.memory_space<vmem>>, vector<8x8xf32>
    %c0_15 = arith.constant 0 : index
    %c0_16 = arith.constant 0 : index
    %38 = vector.load %arg18[%c0_15, %c0_16] : memref<8x32xf32, #tpu.memory_space<vmem>>, vector<8x8xf32>
    %cst_17 = arith.constant dense<0.000000e+00> : vector<8x8xf32>
    %39 = tpu.matmul %36, %37, %cst_17 {dimension_numbers = #tpu.dot_dimension_numbers<[1], [1], [0], [0], [0, 0, 1, 0], [], []>} : vector<8x8xf32>, vector<8x8xf32>, vector<8x8xf32> -> vector<8x8xf32>
    %cst_18 = arith.constant -1.000000e+09 : f32
    %40 = vector.broadcast %cst_18 : f32 to vector<8x8xf32>
    %41 = arith.select %35, %39, %40 : vector<8x8xi1>, vector<8x8xf32>
    %cst_19 = arith.constant dense<0xFF800000> : vector<8xf32>
    %42 = vector.multi_reduction <maximumf>, %41, %cst_19 [1] : vector<8x8xf32> to vector<8xf32>
    %43 = vector.shape_cast %42 : vector<8xf32> to vector<8x1xf32>
    %44 = vector.broadcast %43 : vector<8x1xf32> to vector<8x8xf32>
    %45 = arith.subf %41, %44 : vector<8x8xf32>
    %46 = math.exp %45 : vector<8x8xf32>
    %cst_20 = arith.constant dense<0.000000e+00> : vector<8xf32>
    %47 = vector.multi_reduction <add>, %46, %cst_20 [1] : vector<8x8xf32> to vector<8xf32>
    %48 = vector.shape_cast %47 : vector<8xf32> to vector<8x1xf32>
    %49 = tpu.reciprocal %48 {approx = true} : vector<8x1xf32> -> vector<8x1xf32>
    %50 = vector.broadcast %49 : vector<8x1xf32> to vector<8x8xf32>
    %51 = arith.mulf %46, %50 : vector<8x8xf32>
    %cst_21 = arith.constant dense<0.000000e+00> : vector<8x8xf32>
    %52 = tpu.matmul %51, %38, %cst_21 {dimension_numbers = #tpu.dot_dimension_numbers<[1], [0], [0], [1], [0, 0, 1, 1], [], []>} : vector<8x8xf32>, vector<8x8xf32>, vector<8x8xf32> -> vector<8x8xf32>
    %c0_22 = arith.constant 0 : index
    %c0_23 = arith.constant 0 : index
    %53 = vector.load %arg7[%c0_22, %c0_23] : memref<32x32xf32, #tpu.memory_space<vmem>>, vector<8x32xf32>
    %cst_24 = arith.constant dense<0.000000e+00> : vector<8x32xf32>
    %54 = tpu.matmul %52, %53, %cst_24 {dimension_numbers = #tpu.dot_dimension_numbers<[1], [0], [0], [1], [0, 0, 1, 1], [], []>} : vector<8x8xf32>, vector<8x32xf32>, vector<8x32xf32> -> vector<8x32xf32>
    %55 = arith.addf %10, %54 : vector<8x32xf32>
    %56 = vector.extract_strided_slice %32 {offsets = [0, 8], sizes = [8, 8], strides = [1, 1]} : vector<8x32xf32> to vector<8x8xf32>
    %c0_25 = arith.constant 0 : index
    %c8 = arith.constant 8 : index
    %57 = vector.load %arg17[%c0_25, %c8] : memref<8x32xf32, #tpu.memory_space<vmem>>, vector<8x8xf32>
    %c0_26 = arith.constant 0 : index
    %c8_27 = arith.constant 8 : index
    %58 = vector.load %arg18[%c0_26, %c8_27] : memref<8x32xf32, #tpu.memory_space<vmem>>, vector<8x8xf32>
    %cst_28 = arith.constant dense<0.000000e+00> : vector<8x8xf32>
    %59 = tpu.matmul %56, %57, %cst_28 {dimension_numbers = #tpu.dot_dimension_numbers<[1], [1], [0], [0], [0, 0, 1, 0], [], []>} : vector<8x8xf32>, vector<8x8xf32>, vector<8x8xf32> -> vector<8x8xf32>
    %cst_29 = arith.constant -1.000000e+09 : f32
    %60 = vector.broadcast %cst_29 : f32 to vector<8x8xf32>
    %61 = arith.select %35, %59, %60 : vector<8x8xi1>, vector<8x8xf32>
    %cst_30 = arith.constant dense<0xFF800000> : vector<8xf32>
    %62 = vector.multi_reduction <maximumf>, %61, %cst_30 [1] : vector<8x8xf32> to vector<8xf32>
    %63 = vector.shape_cast %62 : vector<8xf32> to vector<8x1xf32>
    %64 = vector.broadcast %63 : vector<8x1xf32> to vector<8x8xf32>
    %65 = arith.subf %61, %64 : vector<8x8xf32>
    %66 = math.exp %65 : vector<8x8xf32>
    %cst_31 = arith.constant dense<0.000000e+00> : vector<8xf32>
    %67 = vector.multi_reduction <add>, %66, %cst_31 [1] : vector<8x8xf32> to vector<8xf32>
    %68 = vector.shape_cast %67 : vector<8xf32> to vector<8x1xf32>
    %69 = tpu.reciprocal %68 {approx = true} : vector<8x1xf32> -> vector<8x1xf32>
    %70 = vector.broadcast %69 : vector<8x1xf32> to vector<8x8xf32>
    %71 = arith.mulf %66, %70 : vector<8x8xf32>
    %cst_32 = arith.constant dense<0.000000e+00> : vector<8x8xf32>
    %72 = tpu.matmul %71, %58, %cst_32 {dimension_numbers = #tpu.dot_dimension_numbers<[1], [0], [0], [1], [0, 0, 1, 1], [], []>} : vector<8x8xf32>, vector<8x8xf32>, vector<8x8xf32> -> vector<8x8xf32>
    %c8_33 = arith.constant 8 : index
    %c0_34 = arith.constant 0 : index
    %73 = vector.load %arg7[%c8_33, %c0_34] : memref<32x32xf32, #tpu.memory_space<vmem>>, vector<8x32xf32>
    %cst_35 = arith.constant dense<0.000000e+00> : vector<8x32xf32>
    %74 = tpu.matmul %72, %73, %cst_35 {dimension_numbers = #tpu.dot_dimension_numbers<[1], [0], [0], [1], [0, 0, 1, 1], [], []>} : vector<8x8xf32>, vector<8x32xf32>, vector<8x32xf32> -> vector<8x32xf32>
    %75 = arith.addf %55, %74 : vector<8x32xf32>
    %76 = vector.extract_strided_slice %32 {offsets = [0, 16], sizes = [8, 8], strides = [1, 1]} : vector<8x32xf32> to vector<8x8xf32>
    %c0_36 = arith.constant 0 : index
    %c16 = arith.constant 16 : index
    %77 = vector.load %arg17[%c0_36, %c16] : memref<8x32xf32, #tpu.memory_space<vmem>>, vector<8x8xf32>
    %c0_37 = arith.constant 0 : index
    %c16_38 = arith.constant 16 : index
    %78 = vector.load %arg18[%c0_37, %c16_38] : memref<8x32xf32, #tpu.memory_space<vmem>>, vector<8x8xf32>
    %cst_39 = arith.constant dense<0.000000e+00> : vector<8x8xf32>
    %79 = tpu.matmul %76, %77, %cst_39 {dimension_numbers = #tpu.dot_dimension_numbers<[1], [1], [0], [0], [0, 0, 1, 0], [], []>} : vector<8x8xf32>, vector<8x8xf32>, vector<8x8xf32> -> vector<8x8xf32>
    %cst_40 = arith.constant -1.000000e+09 : f32
    %80 = vector.broadcast %cst_40 : f32 to vector<8x8xf32>
    %81 = arith.select %35, %79, %80 : vector<8x8xi1>, vector<8x8xf32>
    %cst_41 = arith.constant dense<0xFF800000> : vector<8xf32>
    %82 = vector.multi_reduction <maximumf>, %81, %cst_41 [1] : vector<8x8xf32> to vector<8xf32>
    %83 = vector.shape_cast %82 : vector<8xf32> to vector<8x1xf32>
    %84 = vector.broadcast %83 : vector<8x1xf32> to vector<8x8xf32>
    %85 = arith.subf %81, %84 : vector<8x8xf32>
    %86 = math.exp %85 : vector<8x8xf32>
    %cst_42 = arith.constant dense<0.000000e+00> : vector<8xf32>
    %87 = vector.multi_reduction <add>, %86, %cst_42 [1] : vector<8x8xf32> to vector<8xf32>
    %88 = vector.shape_cast %87 : vector<8xf32> to vector<8x1xf32>
    %89 = tpu.reciprocal %88 {approx = true} : vector<8x1xf32> -> vector<8x1xf32>
    %90 = vector.broadcast %89 : vector<8x1xf32> to vector<8x8xf32>
    %91 = arith.mulf %86, %90 : vector<8x8xf32>
    %cst_43 = arith.constant dense<0.000000e+00> : vector<8x8xf32>
    %92 = tpu.matmul %91, %78, %cst_43 {dimension_numbers = #tpu.dot_dimension_numbers<[1], [0], [0], [1], [0, 0, 1, 1], [], []>} : vector<8x8xf32>, vector<8x8xf32>, vector<8x8xf32> -> vector<8x8xf32>
    %c16_44 = arith.constant 16 : index
    %c0_45 = arith.constant 0 : index
    %93 = vector.load %arg7[%c16_44, %c0_45] : memref<32x32xf32, #tpu.memory_space<vmem>>, vector<8x32xf32>
    %cst_46 = arith.constant dense<0.000000e+00> : vector<8x32xf32>
    %94 = tpu.matmul %92, %93, %cst_46 {dimension_numbers = #tpu.dot_dimension_numbers<[1], [0], [0], [1], [0, 0, 1, 1], [], []>} : vector<8x8xf32>, vector<8x32xf32>, vector<8x32xf32> -> vector<8x32xf32>
    %95 = arith.addf %75, %94 : vector<8x32xf32>
    %96 = vector.extract_strided_slice %32 {offsets = [0, 24], sizes = [8, 8], strides = [1, 1]} : vector<8x32xf32> to vector<8x8xf32>
    %c0_47 = arith.constant 0 : index
    %c24 = arith.constant 24 : index
    %97 = vector.load %arg17[%c0_47, %c24] : memref<8x32xf32, #tpu.memory_space<vmem>>, vector<8x8xf32>
    %c0_48 = arith.constant 0 : index
    %c24_49 = arith.constant 24 : index
    %98 = vector.load %arg18[%c0_48, %c24_49] : memref<8x32xf32, #tpu.memory_space<vmem>>, vector<8x8xf32>
    %cst_50 = arith.constant dense<0.000000e+00> : vector<8x8xf32>
    %99 = tpu.matmul %96, %97, %cst_50 {dimension_numbers = #tpu.dot_dimension_numbers<[1], [1], [0], [0], [0, 0, 1, 0], [], []>} : vector<8x8xf32>, vector<8x8xf32>, vector<8x8xf32> -> vector<8x8xf32>
    %cst_51 = arith.constant -1.000000e+09 : f32
    %100 = vector.broadcast %cst_51 : f32 to vector<8x8xf32>
    %101 = arith.select %35, %99, %100 : vector<8x8xi1>, vector<8x8xf32>
    %cst_52 = arith.constant dense<0xFF800000> : vector<8xf32>
    %102 = vector.multi_reduction <maximumf>, %101, %cst_52 [1] : vector<8x8xf32> to vector<8xf32>
    %103 = vector.shape_cast %102 : vector<8xf32> to vector<8x1xf32>
    %104 = vector.broadcast %103 : vector<8x1xf32> to vector<8x8xf32>
    %105 = arith.subf %101, %104 : vector<8x8xf32>
    %106 = math.exp %105 : vector<8x8xf32>
    %cst_53 = arith.constant dense<0.000000e+00> : vector<8xf32>
    %107 = vector.multi_reduction <add>, %106, %cst_53 [1] : vector<8x8xf32> to vector<8xf32>
    %108 = vector.shape_cast %107 : vector<8xf32> to vector<8x1xf32>
    %109 = tpu.reciprocal %108 {approx = true} : vector<8x1xf32> -> vector<8x1xf32>
    %110 = vector.broadcast %109 : vector<8x1xf32> to vector<8x8xf32>
    %111 = arith.mulf %106, %110 : vector<8x8xf32>
    %cst_54 = arith.constant dense<0.000000e+00> : vector<8x8xf32>
    %112 = tpu.matmul %111, %98, %cst_54 {dimension_numbers = #tpu.dot_dimension_numbers<[1], [0], [0], [1], [0, 0, 1, 1], [], []>} : vector<8x8xf32>, vector<8x8xf32>, vector<8x8xf32> -> vector<8x8xf32>
    %c24_55 = arith.constant 24 : index
    %c0_56 = arith.constant 0 : index
    %113 = vector.load %arg7[%c24_55, %c0_56] : memref<32x32xf32, #tpu.memory_space<vmem>>, vector<8x32xf32>
    %cst_57 = arith.constant dense<0.000000e+00> : vector<8x32xf32>
    %114 = tpu.matmul %112, %113, %cst_57 {dimension_numbers = #tpu.dot_dimension_numbers<[1], [0], [0], [1], [0, 0, 1, 1], [], []>} : vector<8x8xf32>, vector<8x32xf32>, vector<8x32xf32> -> vector<8x32xf32>
    %115 = arith.addf %95, %114 : vector<8x32xf32>
    %c0_58 = arith.constant 0 : index
    %c0_59 = arith.constant 0 : index
    %116 = vector.load %arg14[%c0_58, %c0_59] : memref<1x32xf32, #tpu.memory_space<vmem>>, vector<1x32xf32>
    %c0_60 = arith.constant 0 : index
    %c0_61 = arith.constant 0 : index
    %117 = vector.load %arg15[%c0_60, %c0_61] : memref<1x32xf32, #tpu.memory_space<vmem>>, vector<1x32xf32>
    %cst_62 = arith.constant dense<0.000000e+00> : vector<8xf32>
    %118 = vector.multi_reduction <add>, %115, %cst_62 [1] : vector<8x32xf32> to vector<8xf32>
    %119 = vector.shape_cast %118 : vector<8xf32> to vector<8x1xf32>
    %cst_63 = arith.constant 3.200000e+01 : f32
    %120 = vector.broadcast %cst_63 : f32 to vector<8x1xf32>
    %121 = arith.divf %119, %120 : vector<8x1xf32>
    %122 = vector.broadcast %121 : vector<8x1xf32> to vector<8x32xf32>
    %123 = arith.subf %115, %122 : vector<8x32xf32>
    %124 = arith.mulf %123, %123 : vector<8x32xf32>
    %cst_64 = arith.constant dense<0.000000e+00> : vector<8xf32>
    %125 = vector.multi_reduction <add>, %124, %cst_64 [1] : vector<8x32xf32> to vector<8xf32>
    %126 = vector.shape_cast %125 : vector<8xf32> to vector<8x1xf32>
    %cst_65 = arith.constant 0.0322580636 : f32
    %127 = vector.broadcast %cst_65 : f32 to vector<8x1xf32>
    %128 = arith.mulf %126, %127 : vector<8x1xf32>
    %129 = math.sqrt %128 : vector<8x1xf32>
    %130 = vector.broadcast %116 : vector<1x32xf32> to vector<8x32xf32>
    %131 = arith.mulf %130, %123 : vector<8x32xf32>
    %cst_66 = arith.constant 9.99999997E-7 : f32
    %132 = vector.broadcast %cst_66 : f32 to vector<8x1xf32>
    %133 = arith.addf %129, %132 : vector<8x1xf32>
    %134 = vector.broadcast %133 : vector<8x1xf32> to vector<8x32xf32>
    %135 = arith.divf %131, %134 : vector<8x32xf32>
    %136 = vector.broadcast %117 : vector<1x32xf32> to vector<8x32xf32>
    %137 = arith.addf %135, %136 : vector<8x32xf32>
    %c0_67 = arith.constant 0 : index
    %c0_68 = arith.constant 0 : index
    %138 = vector.load %arg11[%c0_67, %c0_68] : memref<1x32xf32, #tpu.memory_space<vmem>>, vector<1x32xf32>
    %139 = vector.broadcast %138 : vector<1x32xf32> to vector<8x32xf32>
    %140 = arith.addf %115, %139 : vector<8x32xf32>
    %c0_69 = arith.constant 0 : index
    %c0_70 = arith.constant 0 : index
    %141 = vector.load %arg8[%c0_69, %c0_70] : memref<32x64xf32, #tpu.memory_space<vmem>>, vector<32x64xf32>
    %c0_71 = arith.constant 0 : index
    %c0_72 = arith.constant 0 : index
    %142 = vector.load %arg9[%c0_71, %c0_72] : memref<1x64xf32, #tpu.memory_space<vmem>>, vector<1x64xf32>
    %cst_73 = arith.constant dense<0.000000e+00> : vector<8x64xf32>
    %143 = tpu.matmul %137, %141, %cst_73 {dimension_numbers = #tpu.dot_dimension_numbers<[1], [0], [0], [1], [0, 0, 1, 1], [], []>} : vector<8x32xf32>, vector<32x64xf32>, vector<8x64xf32> -> vector<8x64xf32>
    %144 = vector.broadcast %142 : vector<1x64xf32> to vector<8x64xf32>
    %145 = arith.addf %143, %144 : vector<8x64xf32>
    %cst_74 = arith.constant 0.000000e+00 : f32
    %146 = vector.broadcast %cst_74 : f32 to vector<8x64xf32>
    %147 = arith.maximumf %145, %146 : vector<8x64xf32>
    %c0_75 = arith.constant 0 : index
    %c0_76 = arith.constant 0 : index
    %148 = vector.load %arg10[%c0_75, %c0_76] : memref<64x32xf32, #tpu.memory_space<vmem>>, vector<64x32xf32>
    %cst_77 = arith.constant dense<0.000000e+00> : vector<8x32xf32>
    %149 = tpu.matmul %147, %148, %cst_77 {dimension_numbers = #tpu.dot_dimension_numbers<[1], [0], [0], [1], [0, 0, 1, 1], [], []>} : vector<8x64xf32>, vector<64x32xf32>, vector<8x32xf32> -> vector<8x32xf32>
    %150 = arith.addf %140, %149 : vector<8x32xf32>
    %c0_78 = arith.constant 0 : index
    %c0_79 = arith.constant 0 : index
    %c0_80 = arith.constant 0 : index
    %151 = vector.load %arg16[%c0_78, %c0_79, %c0_80] : memref<1x8x32xf32, #tpu.memory_space<vmem>>, vector<1x8x32xf32>
    %152 = vector.shape_cast %151 : vector<1x8x32xf32> to vector<8x32xf32>
    %153 = vector.shape_cast %150 : vector<8x32xf32> to vector<1x8x32xf32>
    tpu.vector_store %arg16[%c0_78, %c0_79, %c0_80], %153 {strides = array<i32>} : memref<1x8x32xf32, #tpu.memory_space<vmem>>, vector<1x8x32xf32>,
    return
  }
  func.func @transform_0(%arg0: i32, %arg1: i32, %arg2: memref<2xi32, #tpu.memory_space<smem>>) -> (i32, i32, i32) {
    %c0_i32 = arith.constant 0 : i32
    %c0_i32_0 = arith.constant 0 : i32
    %c0_i32_1 = arith.constant 0 : i32
    return %arg0, %c0_i32, %c0_i32_0 : i32, i32, i32
  }
  func.func @transform_1(%arg0: i32, %arg1: i32, %arg2: memref<2xi32, #tpu.memory_space<smem>>) -> (i32, i32) {
    %c0_i32 = arith.constant 0 : i32
    %c0_i32_0 = arith.constant 0 : i32
    %c0_i32_1 = arith.constant 0 : i32
    return %c0_i32, %c0_i32_0 : i32, i32
  }
  func.func @transform_2(%arg0: i32, %arg1: i32, %arg2: memref<2xi32, #tpu.memory_space<smem>>) -> (i32, i32) {
    %c0_i32 = arith.constant 0 : i32
    %c0_i32_0 = arith.constant 0 : i32
    %c0_i32_1 = arith.constant 0 : i32
    return %c0_i32, %c0_i32_0 : i32, i32
  }
  func.func @transform_3(%arg0: i32, %arg1: i32, %arg2: memref<2xi32, #tpu.memory_space<smem>>) -> (i32, i32) {
    %c0_i32 = arith.constant 0 : i32
    %c0_i32_0 = arith.constant 0 : i32
    %c0_i32_1 = arith.constant 0 : i32
    return %c0_i32, %c0_i32_0 : i32, i32
  }
  func.func @transform_4(%arg0: i32, %arg1: i32, %arg2: memref<2xi32, #tpu.memory_space<smem>>) -> (i32, i32) {
    %c0_i32 = arith.constant 0 : i32
    %c0_i32_0 = arith.constant 0 : i32
    %c0_i32_1 = arith.constant 0 : i32
    return %c0_i32, %c0_i32_0 : i32, i32
  }
  func.func @transform_5(%arg0: i32, %arg1: i32, %arg2: memref<2xi32, #tpu.memory_space<smem>>) -> (i32, i32) {
    %c0_i32 = arith.constant 0 : i32
    %c0_i32_0 = arith.constant 0 : i32
    %c0_i32_1 = arith.constant 0 : i32
    return %c0_i32, %c0_i32_0 : i32, i32
  }
  func.func @transform_6(%arg0: i32, %arg1: i32, %arg2: memref<2xi32, #tpu.memory_space<smem>>) -> (i32, i32) {
    %c0_i32 = arith.constant 0 : i32
    %c0_i32_0 = arith.constant 0 : i32
    %c0_i32_1 = arith.constant 0 : i32
    return %c0_i32, %c0_i32_0 : i32, i32
  }
  func.func @transform_7(%arg0: i32, %arg1: i32, %arg2: memref<2xi32, #tpu.memory_space<smem>>) -> (i32, i32) {
    %c0_i32 = arith.constant 0 : i32
    %c0_i32_0 = arith.constant 0 : i32
    %c0_i32_1 = arith.constant 0 : i32
    return %c0_i32, %c0_i32_0 : i32, i32
  }
  func.func @transform_8(%arg0: i32, %arg1: i32, %arg2: memref<2xi32, #tpu.memory_space<smem>>) -> (i32, i32) {
    %c0_i32 = arith.constant 0 : i32
    %c0_i32_0 = arith.constant 0 : i32
    %c0_i32_1 = arith.constant 0 : i32
    return %c0_i32, %c0_i32_0 : i32, i32
  }
  func.func @transform_9(%arg0: i32, %arg1: i32, %arg2: memref<2xi32, #tpu.memory_space<smem>>) -> (i32, i32) {
    %c0_i32 = arith.constant 0 : i32
    %c0_i32_0 = arith.constant 0 : i32
    %c0_i32_1 = arith.constant 0 : i32
    return %c0_i32, %c0_i32_0 : i32, i32
  }
  func.func @transform_10(%arg0: i32, %arg1: i32, %arg2: memref<2xi32, #tpu.memory_space<smem>>) -> (i32, i32) {
    %c0_i32 = arith.constant 0 : i32
    %c0_i32_0 = arith.constant 0 : i32
    %c0_i32_1 = arith.constant 0 : i32
    return %c0_i32, %c0_i32_0 : i32, i32
  }
  func.func @transform_11(%arg0: i32, %arg1: i32, %arg2: memref<2xi32, #tpu.memory_space<smem>>) -> (i32, i32) {
    %c0_i32 = arith.constant 0 : i32
    %c0_i32_0 = arith.constant 0 : i32
    %c0_i32_1 = arith.constant 0 : i32
    return %c0_i32, %c0_i32_0 : i32, i32
  }
  func.func @transform_12(%arg0: i32, %arg1: i32, %arg2: memref<2xi32, #tpu.memory_space<smem>>) -> (i32, i32) {
    %c0_i32 = arith.constant 0 : i32
    %c0_i32_0 = arith.constant 0 : i32
    %c0_i32_1 = arith.constant 0 : i32
    return %c0_i32, %c0_i32_0 : i32, i32
  }
  func.func @transform_13(%arg0: i32, %arg1: i32, %arg2: memref<2xi32, #tpu.memory_space<smem>>) -> (i32, i32, i32) {
    %c0_i32 = arith.constant 0 : i32
    %c0_i32_0 = arith.constant 0 : i32
    return %arg0, %arg1, %c0_i32 : i32, i32, i32
  }
}

</mosaic_0001>

<bundles_post_ra>
// kernel: tpu_custom_call.1
= control target key start
LH: loop header
LB: loop body
LE: loop exit
PB: predicated region body
PF: predicated region fallthrough
CT: control target
= control target key end

     0   :  { %s1672_s16 = smov [#allocation5]   ;;  %s2072_s0 = inlined_call_operand.hbm [shape: s32[2], index: 0, kind: input, shape index: {}]   ;;  %s2073_s1 = inlined_call_operand.hbm [shape: f32[2,8,32], index: 1, kind: input, shape index: {}]   ;;  %s2074_s2 = inlined_call_operand.vmem [shape: f32[32,32], index: 2, kind: input, shape index: {}]   ;;  %s2075_s3 = inlined_call_operand.vmem [shape: f32[32,32], index: 3, kind: input, shape index: {}]   ;;  %s2076_s4 = inlined_call_operand.vmem [shape: f32[32,32], index: 4, kind: input, shape index: {}]   ;;  %s2077_s5 = inlined_call_operand.hbm [shape: f32[32,32], index: 5, kind: input, shape index: {}]   ;;  %s2078_s6 = inlined_call_operand.hbm [shape: f32[32,64], index: 6, kind: input, shape index: {}]   ;;  %s2079_s7 = inlined_call_operand.vmem [shape: f32[1,64], index: 7, kind: input, shape index: {}]   ;;  %s2080_s8 = inlined_call_operand.vmem [shape: f32[64,32], index: 8, kind: input, shape index: {}]   ;;  %s2081_s9 = inlined_call_operand.vmem [shape: f32[1,32], index: 9, kind: input, shape index: {}]   ;;  %s2082_s10 = inlined_call_operand.vmem [shape: f32[1,32], index: 10, kind: input, shape index: {}]   ;;  %s2083_s11 = inlined_call_operand.vmem [shape: f32[1,32], index: 11, kind: input, shape index: {}]   ;;  %s2084_s12 = inlined_call_operand.vmem [shape: f32[1,32], index: 12, kind: input, shape index: {}]   ;;  %s2085_s13 = inlined_call_operand.vmem [shape: f32[1,32], index: 13, kind: input, shape index: {}]   ;;  %s2086_s14 = inlined_call_operand.hbm [shape: f32[2,8,32], index: 14, kind: output, shape index: {}]  }
   0x1   :  { %2091 = sst [smem:[#allocation19_spill]] %s2077_s5  ;;  %s20_s15 = sshll.u32 %s2072_s0, 4  ;;  %s21_s15 = int_to_ptr.hbm [resolvable:$true] %s20_s15 }
   0x2   :  { %2092 = sst [smem:[#allocation20_spill]] %s2078_s6 }
   0x3   :  { %2093 = sst [smem:[#allocation21_spill]] %s2079_s7 }
   0x4   :  { %2094 = sst [smem:[#allocation22_spill]] %s2081_s9 }
   0x5   :  { %2095 = sst [smem:[#allocation23_spill]] %s2086_s14 }
   0x6   :  { %23 = dma.hbm_to_smem %s21_s15, 16, %s1672_s16, [#allocation4] }
   0x7   :  { %1634 = dma.done.wait [#allocation4], 16 }
   0x8   :  { %1635 = vsyncadd [#allocation4], 4294967280 }
   0x9   :  { %26 = sfence }
   0xa   :  { %27 = vsyncpa [#allocation7], 0 }
   0xb   :  { %29 = vsyncpa [#allocation7 + $0x1], 0 }
   0xc   :  { %30 = vsyncpa [#allocation10], 0 }
   0xd   :  { %31 = vsyncpa [#allocation8], 0 }
   0xe   :  { %33 = vsyncpa [#allocation8 + $0x1], 0  ;;  %s1759_s17 = smov 0   ;;  %s1761_s18 = smov 0  }
   0xf   :  { %s1763_s19 = smov 0   ;;  %s1765_s20 = smov 0  }
  0x10   :  { %s1767_s0 = smov 0   ;;  %s1769_s21 = smov 0  }
  0x11 LB: > { %2096 = sst [smem:[#allocation17_spill]] %s1650_s17  ;;  %s2087_s22 = sadd.s32 4294967295, %s1670_s21   ;;  %s1670_s21 = sphi %s1769_s21, %s39_s21   ;;  %s1666_s0 = sphi %s1767_s0, %s2117_s0   ;;  %s1662_s20 = sphi %s1765_s20, %s2116_s20   ;;  %s1658_s19 = sphi %s1763_s19, %s2115_s19   ;;  %s1654_s18 = sphi %s1761_s18, %s2114_s18   ;;  %s1650_s17 = sphi %s1759_s17, %s2113_s17  }
  0x12   : > { %p1318_p0 = scmp.ge.s32.totalorder %s1670_s21, 1  ;;  %p1793_p1 = scmp.eq.s32.totalorder %s2087_s22, 0 }
  0x13   : > { %p362_p2 = scmp.lt.s32.totalorder %s1670_s21, 3  ;;  %s2098_s5 = sld [smem:[#allocation19_spill]] }
  0x14   : > { %s1673_s28 = smov [#allocation9]   ;;  %p1321_p6 = scmp.ge.s32.totalorder %s1670_s21, 2 }
  0x15   : > { %p1801_p3 = pnand %p1318_p0, %p362_p2  ;;  %s384_s29 = sshll.u32 %s1673_s28, 4  ;;  %s385_s29 = int_to_ptr.vmem [resolvable:$true] %s384_s29 }
  0x16   : > { %s2100_s6 = sld [smem:[#allocation20_spill]]  ;;  %s1674_s24 = smov 128  }
  0x17   : > { %p1366_p4 = pneg %p1801_p3  ;;  %s1675_s25 = smov 8  }
  0x18   : > { %s1676_s28 = smov [#allocation11]   ;;  %s1317_s14 = sadd.s32 4294967294, %s1670_s21  }
  0x19   : > { %s382_s26 = sshll.u32 %s2098_s5, 4  ;;  %p1367_p5 = pnand %p1366_p4, %p1793_p1  ;;  %s383_s26 = int_to_ptr.hbm [resolvable:$true] %s382_s26 }
  0x1a   : > { %s398_s22 = sshll.u32 %s1676_s28, 4  ;;  %s51_s5 = sadd.s32 1, %s1666_s0  ;;  %s399_s22 = int_to_ptr.vmem [resolvable:$true] %s398_s22 }
  0x1b   : > { %1369 = dma.hbm_to_vmem [thread:$0]  (!%p1367_p5), %s383_s26, 512, %s385_s29, [#allocation10], %s1674_s24, %s1674_s24, %s1675_s25  }
  0x1c   : > { %s396_s16 = sshll.u32 %s2100_s6, 4  ;;  %p53_p7 = scmp.ge.s32.totalorder %s51_s5, 2  ;;  %s397_s16 = int_to_ptr.hbm [resolvable:$true] %s396_s16 }
  0x1d   : > { %1372 = dma.hbm_to_vmem [thread:$0]  (!%p1367_p5), %s397_s16, 512, %s399_s22, [#allocation10], %s1674_s24, %s1674_s24, %s1675_s25  }
  0x1e   : > { %s58_s30 = sadd.s32 1, %s1658_s19  ;;  %p65_p8 = scmp.ne.s32.totalorder %s1658_s19, %s1654_s18 }
  0x1f   : > { %s2119_s5 = smov (%p53_p7, %s51_s5), 0  ;;  %p66_p9 = scmp.eq.s32.totalorder %s1670_s21, 0 }
  0x20   : > { %2101 = sst [smem:[#allocation18_spill]] %s2119_s5  ;;  %p71_p10 = scmp.ne.s32.totalorder %s1654_s18, %s1650_s17 }
  0x21   : > { %s55_s26 = ssub.s32 %s1666_s0, %s2119_s5  ;;  %s2102_s29 = sadd.s32 4294967295, %s1670_s21  }
  0x22   : > { %p349_p11 = scmp.eq.s32.totalorder %s2102_s29, 1  ;;  %p56_p12 = scmp.eq.s32.totalorder %s55_s26, 0 }
  0x23   : > { %p1829_p13 = por %p1793_p1, %p71_p10  ;;  %p355_p2 = scmp.eq.s32.totalorder %s1317_s14, 1 }
  0x24   : > { %p1833_p0 = por %p349_p11, %p65_p8  ;;  %p67_p4 = por %p66_p9, %p65_p8 }
  0x25   : > { %s1838_s16 = scalar_select %p56_p12, %s1658_s19, %s58_s30  }
  0x26   : > { %p1840_p5 = por %p355_p2, %p71_p10  ;;  %s433_s25 = sand.u32 1, %s1658_s19  }
  0x27   : > { %s1323_s28 = sshll.u32 %s1666_s0, 3  ;;  %p1383_p7 = scmp.lt.s32.totalorder %s1670_s21, 2 }
  0x28   : > { %s1322_s26 = sshll.u32 %s433_s25, 3  ;;  %s441_s5 = scalar_lea.hbm %s2073_s1, %s1323_s28 }
  0x29   : > { %s443_s17 = sshll.u32 %s441_s5, 4  ;;  %s437_s9 = scalar_lea.vmem [#allocation6], %s1322_s26  ;;  %s444_s17 = int_to_ptr.hbm [resolvable:$true] %s443_s17 }
  0x2a   : > { %s445_s7 = sshll.u32 %s437_s9, 4  ;;  %p1374_p11 = pnand %p1383_p7, %p67_p4  ;;  %s446_s7 = int_to_ptr.vmem [resolvable:$true] %s445_s7 }
  0x2b   : > { %s434_s14 = scalar_lea.sflag [#allocation7], %s433_s25  ;;  %454 = sbr.rel (%p1801_p3) target bundleno = 2292 (0x8f4), region = 72 }
  0x2c   : > { %1376 = dma.hbm_to_vmem [thread:$0]  (!%p1374_p11), %s444_s17, 128, %s446_s7, %s434_s14  }
  0x2d   : > { %s1853_s30 = sand.u32 (!%p1801_p3), 1, %s1654_s18  }
  0x2e   : > { %s1325_s6 = sshll.u32 (!%p1801_p3), %s1853_s30, 3  ;;  %s457_s28 = scalar_lea.sflag (!%p1801_p3), [#allocation7], %s1853_s30 }
  0x2f   : > { %s460_s5 = scalar_lea.vmem (!%p1801_p3), [#allocation6], %s1325_s6 }
  0x30   : > { %1637 = dma.done.wait (%p1829_p13), %s457_s28, 128  }
  0x31   : > { %1639 = vsyncadd (%p1829_p13), %s457_s28, 4294967168 }
  0x32   : > { %1641 = dma.done.wait (%p1793_p1), [#allocation10], 1024  }
  0x33   : > { %1643 = vsyncadd (%p1793_p1), [#allocation10], 4294966272  ;;  %vm522_vm0 = vcmask 261120   ;;  %v1867_v0 = vld [vmem:[%s460_s5] sm:$0xff]  ;;  %v1677_v2 = vmov 32.0   ;;  %v577_v23 = vld [vmem:[%s2075_s3 + $0x8] sm:$0xff] }
  0x34   : > { %v523_v1 = vsel %vm522_vm0, %v1867_v0, 0.0  ;;  %1450 = vrcp.f32 %v1677_v2  ;;  %v579_v19 = vld [vmem:[%s2075_s3 + $0x18] sm:$0xff]  ;;  %v578_v21 = vld [vmem:[%s2075_s3 + $0x10] sm:$0xff]  ;;  %v605_v24 = vld [vmem:[%s2076_s4 + $0x8] sm:$0xff]  ;;  %vm719_vm14 = vcmask 64512   ;;  %s1678_s27 = smov 120  }
  0x35   : > { %524 = vadd.xlane.f32.xlu0 %v523_v1  ;;  %v607_v20 = vld [vmem:[%s2076_s4 + $0x18] sm:$0xff]  ;;  %595 = vmatpush.msra.mxu0 %v579_v19  ;;  %v606_v22 = vld [vmem:[%s2076_s4 + $0x10] sm:$0xff]  ;;  %v576_v26 = vld [vmem:[%s2075_s3] sm:$0xff]  ;;  %s514_s22 = sld [smem:[#allocation5 + %s1662_s20]]  ;;  %s1679_s25 = smov 104  }
  0x36   : > { %620 = vmatpush.msra.mxu1 %v607_v20  ;;  %v604_v27 = vld [vmem:[%s2076_s4] sm:$0xff]  ;;  %v689_v35 = vld [vmem:[%s2074_s2 + $0x18] sm:$0xff]  ;;  %v688_v36 = vld [vmem:[%s2074_s2 + $0x10] sm:$0xff]  ;;  %s1680_s26 = smov 112   ;;  %s2109_s28 = sld [smem:[#allocation22_spill]] }
  0x37   : > { %596 = vmatpush.msra.mxu0 %v578_v21  ;;  %705 = vmatpush.msra.mxu2 %v689_v35  ;;  %v687_v39 = vld [vmem:[%s2074_s2 + $0x8] sm:$0xff]  ;;  %v686_v42 = vld [vmem:[%s2074_s2] sm:$0xff]  ;;  %s2110_s9 = sld [smem:[#allocation23_spill]]  ;;  %s513_s23 = scalar_lea.vmem [#allocation12], %s1325_s6 }
  0x38   : > { %621 = vmatpush.msra.mxu1 %v606_v22  ;;  %v1444_v61 = vld [vmem:[%s2082_s10] ss:$0 sm:$0xff] }
  0x39   : > { %597 = vmatpush.msra.mxu0 %v577_v23  ;;  %706 = vmatpush.msra.mxu2 %v688_v36 }
  0x3a   : > { %v1451_v3 = vpop.eup %1450  ;;  %622 = vmatpush.msra.mxu1 %v605_v24 }
  0x3b   : > { %v527_v4 = vmul.f32 32.0, %v1451_v3  ;;  %vm531_vm1 = vweird.f32 %v1451_v3  ;;  %598 = vmatpush.msra.mxu0 %v576_v26  ;;  %707 = vmatpush.msra.mxu2 %v687_v39 }
  0x3c   : > { %623 = vmatpush.msra.mxu1 %v604_v27 }
  0x3d   : > { %634 = vadd.xlane.f32.xlu0 %v523_v1  ;;  %v528_v5 = vsub.f32 1.0, %v527_v4  ;;  %708 = vmatpush.msra.mxu2 %v686_v42  ;;  %s1602_s14 = scalar_lea.hbm %s2110_s9, 16 }
  0x3f   : > { %v529_v6 = vmul.f32 %v1451_v3, %v528_v5 }
  0x41   : > { %v530_v7 = vadd.f32 %v1451_v3, %v529_v6  ;;  %v1445_v6 = vld [vmem:[%s2083_s11] ss:$0 sm:$0xff] }
  0x43   : > { %v1871_v8 = vsel %vm531_vm1, %v1451_v3, %v530_v7 }
  0xa8   : > { %v525_v9 = vpop.xlane.xlu0 %524 }
  0xa9   : > { %v533_v10 = vmul.f32 %v1871_v8, %v525_v9 }
  0xab   : > { %v1875_v11 = vsub.f32 %v1867_v0, %v533_v10 }
  0xad   : > { %v535_v12 = vmul.f32 %v1875_v11, %v1875_v11  ;;  %v555_v4 = vmul.f32 %v1444_v61, %v1875_v11 }
  0xaf   : > { %v536_v13 = vsel %vm522_vm0, %v535_v12, 0.0 }
  0xb0   : > { %537 = vadd.xlane.f32.xlu1 %v536_v13  ;;  %v635_v14 = vpop.xlane.xlu0 %634 }
  0xb1   : > { %v643_v15 = vmul.f32 %v635_v14, %v1871_v8 }
  0xb3   : > { %v1882_v16 = vsub.f32 %v1867_v0, %v643_v15 }
  0xb5   : > { %v645_v17 = vmul.f32 %v1882_v16, %v1882_v16  ;;  %v665_v19 = vmul.f32 %v1444_v61, %v1882_v16 }
  0xb7   : > { %v646_v18 = vsel %vm522_vm0, %v645_v17, 0.0 }
  0xb8   : > { %647 = vadd.xlane.f32.xlu1 %v646_v18 }
 0x123   : > { %v538_v25 = vpop.xlane.xlu1 %537 }
 0x124   : > { %v539_v28 = vmul.f32 0.032258064, %v538_v25 }
 0x126   : > { %1452 = vrsqrt.f32 %v539_v28  ;;  %vm547_vm2 = vcmp.eq.f32.partialorder %v539_v28, inf  ;;  %v550_v45 = vand.u32 2147483648, %v539_v28  ;;  %vm549_vm3 = vcmp.eq.f32.partialorder %v539_v28, 0.0 }
 0x12b   : > { %v648_v29 = vpop.xlane.xlu1 %647 }
 0x12c   : > { %v1453_v30 = vpop.eup %1452  ;;  %v649_v31 = vmul.f32 0.032258064, %v648_v29 }
 0x12d   : > { %v541_v32 = vmul.f32 %v1453_v30, %v539_v28 }
 0x12e   : > { %1454 = vrsqrt.f32 %v649_v31  ;;  %vm657_vm4 = vcmp.eq.f32.partialorder %v649_v31, inf  ;;  %v660_v53 = vand.u32 2147483648, %v649_v31  ;;  %vm659_vm5 = vcmp.eq.f32.partialorder %v649_v31, 0.0 }
 0x12f   : > { %v542_v33 = vmul.f32 %v1453_v30, %v541_v32  ;;  %v715_v32 = vstv %s514_s22 }
 0x131   : > { %v543_v34 = vmul.f32 0.5, %v542_v33  ;;  %v1055_v33 = vld [vmem:[#allocation9 + $0x18] sm:$0xff] }
 0x133   : > { %v544_v37 = vsub.f32 1.5, %v543_v34 }
 0x134   : > { %v1455_v38 = vpop.eup %1454 }
 0x135   : > { %v545_v40 = vmul.f32 %v1453_v30, %v544_v37  ;;  %v651_v41 = vmul.f32 %v1455_v38, %v649_v31  ;;  %v713_v30 = vlaneseq }
 0x137   : > { %v546_v43 = vmul.f32 %v545_v40, %v539_v28  ;;  %v652_v44 = vmul.f32 %v1455_v38, %v651_v41 }
 0x139   : > { %v653_v46 = vmul.f32 0.5, %v652_v44  ;;  %v548_v47 = vsel %vm547_vm2, %v539_v28, %v546_v43 }
 0x13a   : > { %v551_v48 = vsel %vm549_vm3, %v550_v45, %v548_v47 }
 0x13b   : > { %v654_v49 = vsub.f32 1.5, %v653_v46  ;;  %v556_v50 = vadd.f32 1e-06, %v551_v48  ;;  %v873_v48 = vld [vmem:[#allocation9 + $0x8] sm:$0xff] }
 0x13d   : > { %v655_v51 = vmul.f32 %v1455_v38, %v654_v49  ;;  %1456 = vrcp.f32 %v556_v50  ;;  %v568_v60 = vand.u32 2147483648, %v556_v50  ;;  %v566_v63 = vand.u32 2147483647, %v556_v50 }
 0x13e   : > { %vm562_vm7 = vweird.f32 %v556_v50 }
 0x13f   : > { %v656_v52 = vmul.f32 %v655_v51, %v649_v31  ;;  %v569_v3 = vor.u32 1.1754944e-38, %v568_v60  ;;  %vm567_vm9 = vcmp.eq.f32.partialorder %v566_v63, 8.507059e+37 }
 0x141   : > { %v658_v54 = vsel %vm657_vm4, %v649_v31, %v656_v52  ;;  %v714_v31 = vand.u32 127, %v713_v30 }
 0x142   : > { %v661_v55 = vsel %vm659_vm5, %v660_v53, %v658_v54 }
 0x143   : > { %v1457_v56 = vpop.eup %1456  ;;  %v666_v57 = vadd.f32 1e-06, %v661_v55  ;;  %vm1944_vm15 = vcmp.lt.s32.totalorder %v714_v31, %v715_v32 }
 0x144   : > { %v558_v58 = vmul.f32 %v1457_v56, %v556_v50  ;;  %vm563_vm6 = vweird.f32 %v1457_v56 }
 0x145   : > { %1458 = vrcp.f32 %v666_v57  ;;  %vm564_vm8 = vmor %vm562_vm7, %vm563_vm6  ;;  %v678_v13 = vand.u32 2147483648, %v666_v57  ;;  %v676_v17 = vand.u32 2147483647, %v666_v57  ;;  %vm672_vm11 = vweird.f32 %v666_v57 }
 0x146   : > { %v559_v59 = vsub.f32 1.0, %v558_v58  ;;  %vm1173_vm7 = vcmask 523264  }
 0x147   : > { %v679_v18 = vor.u32 1.1754944e-38, %v678_v13  ;;  %vm677_vm13 = vcmp.eq.f32.partialorder %v676_v17, 8.507059e+37 }
 0x148   : > { %v560_v62 = vmul.f32 %v1457_v56, %v559_v59 }
 0x14a   : > { %v561_v1 = vadd.f32 %v1457_v56, %v560_v62 }
 0x14b   : > { %v1459_v2 = vpop.eup %1458 }
 0x14c   : > { %v565_v5 = vsel %vm564_vm8, %v1457_v56, %v561_v1  ;;  %v668_v7 = vmul.f32 %v1459_v2, %v666_v57  ;;  %vm673_vm10 = vweird.f32 %v1459_v2  ;;  %v781_v56 = vld [vmem:[#allocation9] sm:$0xff] }
 0x14d   : > { %v570_v9 = vsel %vm567_vm9, %v569_v3, %v565_v5  ;;  %vm674_vm12 = vmor %vm672_vm11, %vm673_vm10 }
 0x14e   : > { %v571_v10 = vmul.f32 %v570_v9, %v555_v4  ;;  %v669_v12 = vsub.f32 1.0, %v668_v7 }
 0x150   : > { %v575_v14 = vadd.f32 %v1445_v6, %v571_v10  ;;  %v670_v15 = vmul.f32 %v1459_v2, %v669_v12 }
 0x152   : > { %1329 = vmatmul.msk.f32.vlgmr.msra.gmra.mxu0 %vm522_vm0, %v575_v14  ;;  %1330 = vmatmul.msk.f32.vlgmr.msra.gmra.mxu1 %vm522_vm0, %v575_v14  ;;  %v671_v11 = vadd.f32 %v1459_v2, %v670_v15 }
 0x154   : > { %v675_v20 = vsel %vm674_vm12, %v1459_v2, %v671_v11 }
 0x155   : > { %v680_v21 = vsel %vm677_vm13, %v679_v18, %v675_v20 }
 0x156   : > { %v681_v22 = vmul.f32 %v680_v21, %v665_v19 }
 0x158   : > { %v685_v23 = vadd.f32 %v1445_v6, %v681_v22 }
 0x15a   : > { %1331 = vmatmul.msk.f32.vlgmr.msra.gmra.mxu2 %vm522_vm0, %v685_v23 }
 0x1cf   : > { %v600_v24 = vpop.f32.mrf.mxu0  ;;  %v625_v25 = vpop.f32.mrf.mxu1 }
 0x1d0   : > { %603 = vst.msk [vmem:[#allocation2] sm:$0xff] %vm522_vm0, %v600_v24 }
 0x1d1   : > { %628 = vst.msk [vmem:[#allocation3] sm:$0xff] %vm522_vm0, %v625_v25 }
 0x1d7   : > { %v717_v26 = vld [vmem:[#allocation2] sm:$0xff] }
 0x1d8   : > { %v1936_v27 = vld [vmem:[#allocation3] sm:$0xff]  ;;  %808 = vrot.lane.b32.xlu2 %v717_v26, %s1678_s27  ;;  %1332 = vmatpush.xpose.msk.msrb.mxu0 %vm719_vm14, %v717_v26 }
 0x1d9   : > { %776 = vmatpush.msra.mxu3 %v1936_v27 }
 0x1db   : > { %892 = vmatpush.msrb.mxu3 %v873_v48 }
 0x1dc   : > { %800 = vmatpush.msra.mxu0 %v781_v56  ;;  %v1170_v56 = vld [vmem:[%s2080_s8 + $0x28] sm:$0xff] }
 0x1dd   : > { %v710_v16 = vpop.f32.mrf.mxu2 }
 0x1de   : > { %1333 = vmatmul.msk.f32.vlgmr.msrb.gmra.mxu0 %vm719_vm14, %v710_v16 }
 0x1e0   : > { %806 = vrot.lane.b32.xlu2 %v710_v16, %s1678_s27 }
 0x232   : > { %v809_v28 = vpop.permute.xlu2 %808 }
 0x233   : > { %1336 = vmatpush.xpose.msk.msrb.mxu1 %vm719_vm14, %v809_v28  ;;  %v964_v28 = vld [vmem:[#allocation9 + $0x10] sm:$0xff] }
 0x23a   : > { %v807_v29 = vpop.permute.xlu2 %806 }
 0x23b   : > { %1337 = vmatmul.msk.f32.vlgmr.msrb.gmra.mxu1 %vm719_vm14, %v807_v29 }
 0x25b   : > { %v743_v34 = vpop.f32.mrf.mxu0 }
 0x25c   : > { %v746_v35 = vsel %vm1944_vm15, %v743_v34, -1e+09 }
 0x25d   : > { %v747_v36 = vsel %vm719_vm14, %v746_v35, -inf }
 0x25e   : > { %748 = vmax.xlane.f32.xlu0 %v747_v36 }
 0x2b8   : > { %v831_v37 = vpop.f32.mrf.mxu1 }
 0x2b9   : > { %v834_v38 = vsel %vm1944_vm15, %v831_v37, -1e+09 }
 0x2ba   : > { %v835_v39 = vsel %vm719_vm14, %v834_v38, -inf }
 0x2bb   : > { %836 = vmax.xlane.f32.xlu1 %v835_v39 }
 0x2d1   : > { %v749_v40 = vpop.xlane.xlu0 %748 }
 0x2d2   : > { %v750_v41 = vsub.f32 %v746_v35, %v749_v40 }
 0x2d4   : > { %v751_v42 = vmul.f32 1.442695, %v750_v41  ;;  %847 = vrot.lane.b32.xlu1 %v1936_v27, %s1678_s27  ;;  %s1213_s27 = sshll.u32 %s513_s23, 4  ;;  %s1214_s27 = int_to_ptr.vmem [resolvable:$true] %s1213_s27 }
 0x2d6   : > { %1460 = vpow2.f32 %v751_v42 }
 0x2dc   : > { %v1461_v43 = vpop.eup %1460  ;;  %991 = vrot.lane.b32.xlu1 %v717_v26, %s1679_s25 }
 0x2dd   : > { %v753_v44 = vsel %vm719_vm14, %v1461_v43, 0.0 }
 0x2de   : > { %754 = vadd.xlane.f32.xlu2 %v753_v44  ;;  %v1136_v44 = vld [vmem:[#allocation11 + $0x18] sm:$0xff] }
 0x2e4   : > { %989 = vrot.lane.b32.xlu1 %v710_v16, %s1679_s25 }
 0x32e   : > { %v837_v45 = vpop.xlane.xlu1 %836 }
 0x32f   : > { %v838_v46 = vsub.f32 %v834_v38, %v837_v45  ;;  %v1135_v45 = vld [vmem:[#allocation11 + $0x10] sm:$0xff] }
 0x331   : > { %v839_v47 = vmul.f32 1.442695, %v838_v46  ;;  %v1134_v46 = vld [vmem:[#allocation11 + $0x8] sm:$0xff] }
 0x333   : > { %1462 = vpow2.f32 %v839_v47  ;;  %v1133_v47 = vld [vmem:[#allocation11] sm:$0xff] }
 0x339   : > { %v1463_v49 = vpop.eup %1462 }
 0x33a   : > { %v841_v50 = vsel %vm719_vm14, %v1463_v49, 0.0 }
 0x33b   : > { %842 = vadd.xlane.f32.xlu0 %v841_v50 }
 0x346   : > { %v848_v51 = vpop.permute.xlu1 %847 }
 0x347   : > { %868 = vmatpush.msrb.mxu2 %v848_v51 }
 0x349   : > { %983 = vmatpush.msra.mxu2 %v964_v28 }
 0x34e   : > { %v992_v55 = vpop.permute.xlu1 %991 }
 0x34f   : > { %900 = vrot.lane.b32.xlu0 %v717_v26, %s1680_s26 }
 0x351   : > { %v755_v52 = vpop.xlane.xlu2 %754 }
 0x352   : > { %1464 = vrcp.f32 %v755_v52 }
 0x356   : > { %v990_v1 = vpop.permute.xlu1 %989 }
 0x357   : > { %898 = vrot.lane.b32.xlu0 %v710_v16, %s1680_s26 }
 0x358   : > { %v1465_v53 = vpop.eup %1464 }
 0x359   : > { %v757_v54 = vmul.f32 %v1465_v53, %v1461_v43  ;;  %v1172_v53 = vld [vmem:[%s2080_s8 + $0x38] sm:$0xff] }
 0x35b   : > { %1334 = vmatmul.msk.f32.vlgmr.msra.gmra.mxu3 %vm719_vm14, %v757_v54  ;;  %v1171_v54 = vld [vmem:[%s2080_s8 + $0x30] sm:$0xff] }
 0x35c   : > { %1344 = vmatpush.xpose.msk.msra.mxu3 %vm719_vm14, %v992_v55 }
 0x3ae   : > { %v843_v57 = vpop.xlane.xlu0 %842 }
 0x3af   : > { %1466 = vrcp.f32 %v843_v57 }
 0x3b5   : > { %v1467_v58 = vpop.eup %1466 }
 0x3b6   : > { %v845_v59 = vmul.f32 %v1467_v58, %v1463_v49  ;;  %v1169_v58 = vld [vmem:[%s2080_s8 + $0x20] sm:$0xff] }
 0x3b8   : > { %1338 = vmatmul.msk.f32.vlgmr.msrb.gmra.mxu2 %vm719_vm14, %v845_v59 }
 0x3b9   : > { %1156 = vmatpush.msrb.mxu2 %v1136_v44 }
 0x3bb   : > { %1157 = vmatpush.msrb.mxu2 %v1135_v45 }
 0x3bd   : > { %1158 = vmatpush.msrb.mxu2 %v1134_v46 }
 0x3bf   : > { %1159 = vmatpush.msrb.mxu2 %v1133_v47 }
 0x3c1   : > { %v901_v60 = vpop.permute.xlu0 %900 }
 0x3c2   : > { %1340 = vmatpush.xpose.msk.msrb.mxu0 %vm719_vm14, %v901_v60 }
 0x3c9   : > { %v899_v62 = vpop.permute.xlu0 %898 }
 0x3de   : > { %v778_v61 = vpop.f32.mrf.mxu3 }
 0x3df   : > { %1335 = vmatmul.msk.f32.vlgmr.msra.gmra.mxu0 %vm719_vm14, %v778_v61  ;;  %v1168_v61 = vld [vmem:[%s2080_s8 + $0x18] sm:$0xff] }
 0x3e7   : > { %1341 = vmatmul.msk.f32.vlgmr.msrb.gmra.mxu0 %vm719_vm14, %v899_v62 }
 0x43b   : > { %v870_v63 = vpop.f32.mrf.mxu2 }
 0x43c   : > { %1339 = vmatmul.msk.f32.vlgmr.msrb.gmra.mxu3 %vm719_vm14, %v870_v63 }
 0x43d   : > { %1185 = vmatpush.msrb.mxu3 %v1172_v53 }
 0x43f   : > { %1186 = vmatpush.msrb.mxu3 %v1171_v54 }
 0x441   : > { %1187 = vmatpush.msrb.mxu3 %v1170_v56 }
 0x443   : > { %1188 = vmatpush.msrb.mxu3 %v1169_v58 }
 0x444   : > { %1345 = vmatmul.msk.f32.vlgmr.msra.gmra.mxu3 %vm719_vm14, %v990_v1 }
 0x445   : > { %1189 = vmatpush.msrb.mxu3 %v1168_v61 }
 0x45c   : > { %v802_v2 = vpop.f32.mrf.mxu0 }
 0x45d   : > { %v805_v6 = vadd.f32 %v802_v2, %v1867_v0 }
 0x464   : > { %v923_v3 = vpop.f32.mrf.mxu0 }
 0x465   : > { %v926_v4 = vsel %vm1944_vm15, %v923_v3, -1e+09 }
 0x466   : > { %v927_v5 = vsel %vm719_vm14, %v926_v4, -inf }
 0x467   : > { %928 = vmax.xlane.f32.xlu2 %v927_v5 }
 0x47f   : > { %938 = vrot.lane.b32.xlu2 %v1936_v27, %s1680_s26  ;;  %s1351_s26 = sshll.u32 %s1662_s20, 3  ;;  %s1200_s20 = scalar_lea.sflag [#allocation8], %s1853_s30 }
 0x480   : > { %s1211_s17 = scalar_lea.hbm %s2110_s9, %s1351_s26 }
 0x481   : > { %s1215_s22 = sshll.u32 %s1211_s17, 4  ;;  %s1216_s22 = int_to_ptr.hbm [resolvable:$true] %s1215_s22 }
 0x4bf   : > { %v894_v7 = vpop.f32.mrf.mxu3 }
 0x4c0   : > { %v897_v9 = vadd.f32 %v894_v7, %v805_v6  ;;  %v1446_v6 = vld [vmem:[%s2084_s12] ss:$0 sm:$0xff] }
 0x4c7   : > { %v1014_v10 = vpop.f32.mrf.mxu3 }
 0x4c8   : > { %v1017_v12 = vsel %vm1944_vm15, %v1014_v10, -1e+09 }
 0x4c9   : > { %v1018_v13 = vsel %vm719_vm14, %v1017_v12, -inf }
 0x4ca   : > { %1019 = vmax.xlane.f32.xlu0 %v1018_v13 }
 0x4da   : > { %v929_v14 = vpop.xlane.xlu2 %928 }
 0x4db   : > { %v930_v15 = vsub.f32 %v926_v4, %v929_v14 }
 0x4dd   : > { %v931_v17 = vmul.f32 1.442695, %v930_v15  ;;  %v1447_v15 = vld [vmem:[%s2085_s13] ss:$0 sm:$0xff] }
 0x4df   : > { %1468 = vpow2.f32 %v931_v17 }
 0x4e2   : > { %v939_v11 = vpop.permute.xlu2 %938 }
 0x4e3   : > { %959 = vmatpush.msra.mxu1 %v939_v11 }
 0x4e5   : > { %v1469_v18 = vpop.eup %1468  ;;  %1074 = vmatpush.msrb.mxu1 %v1055_v33 }
 0x4e6   : > { %v933_v19 = vsel %vm719_vm14, %v1469_v18, 0.0 }
 0x4e7   : > { %934 = vadd.xlane.f32.xlu1 %v933_v19  ;;  %v1167_v19 = vld [vmem:[%s2080_s8 + $0x10] sm:$0xff] }
 0x4e8   : > { %1190 = vmatpush.msrb.mxu3 %v1167_v19 }
 0x53d   : > { %v1020_v0 = vpop.xlane.xlu0 %1019 }
 0x53e   : > { %v1021_v20 = vsub.f32 %v1017_v12, %v1020_v0  ;;  %v1166_v0 = vld [vmem:[%s2080_s8 + $0x8] sm:$0xff] }
 0x53f   : > { %1191 = vmatpush.msrb.mxu3 %v1166_v0 }
 0x540   : > { %v1022_v21 = vmul.f32 1.442695, %v1021_v20  ;;  %v1165_v20 = vld [vmem:[%s2080_s8] sm:$0xff] }
 0x541   : > { %1192 = vmatpush.msrb.mxu3 %v1165_v20 }
 0x542   : > { %1470 = vpow2.f32 %v1022_v21 }
 0x548   : > { %v1471_v22 = vpop.eup %1470 }
 0x549   : > { %v1024_v23 = vsel %vm719_vm14, %v1471_v22, 0.0 }
 0x54a   : > { %1025 = vadd.xlane.f32.xlu2 %v1024_v23 }
 0x55a   : > { %v935_v24 = vpop.xlane.xlu1 %934 }
 0x55b   : > { %1472 = vrcp.f32 %v935_v24 }
 0x561   : > { %v1473_v25 = vpop.eup %1472 }
 0x562   : > { %v937_v26 = vmul.f32 %v1473_v25, %v1469_v18  ;;  %1029 = vrot.lane.b32.xlu2 %v1936_v27, %s1679_s25  ;;  %s2108_s25 = sld [smem:[#allocation21_spill]]  ;;  %v1449_v25 = vld [vmem:[%s2109_s28] ss:$0 sm:$0xff] }
 0x564   : > { %1342 = vmatmul.msk.f32.vlgmr.msra.gmra.mxu1 %vm719_vm14, %v937_v26 }
 0x568   : > { %v1448_v21 = vld [vmem:[%s2108_s25] ss:$0 sm:$0xff]  ;;  %s1596_s25 = sshra.s32 %s1216_s22, 4  ;;  %s1597_s25 = int_to_ptr.hbm [resolvable:$true] %s1596_s25 }
 0x569   : > { %s1598_s29 = scalar_lea.hbm %s1597_s25, 8  ;;  %p1603_p9 = scmp.lt.s32.totalorder %s1597_s25, %s2110_s9 }
 0x56a   : > { %p1599_p1 = scmp.ne.s32.totalorder %s1597_s25, %s1598_s29  ;;  %p1604_p10 = scmp.lt.s32.totalorder %s1602_s14, %s1598_s29 }
 0x56c   : > { %p1600_p3 = pnand %p1599_p1, %p1833_p0  ;;  %p1605_p12 = por %p1604_p10, %p1603_p9 }
 0x56e   : > { %p1601_p8 = pneg %p1600_p3 }
 0x570   : > { %p1606_p13 = pnand %p1605_p12, %p1601_p8 }
 0x5bd   : > { %v1026_v16 = vpop.xlane.xlu2 %1025 }
 0x5be   : > { %1474 = vrcp.f32 %v1026_v16 }
 0x5c4   : > { %v1475_v29 = vpop.eup %1474 }
 0x5c5   : > { %v1028_v30 = vmul.f32 %v1475_v29, %v1471_v22  ;;  %v1030_v31 = vpop.permute.xlu2 %1029 }
 0x5c6   : > { %1050 = vmatpush.msra.mxu0 %v1030_v31 }
 0x5c7   : > { %1346 = vmatmul.msk.f32.vlgmr.msra.gmra.mxu0 %vm719_vm14, %v1028_v30 }
 0x5e1   : > { %v961_v32 = vpop.f32.mrf.mxu1 }
 0x5e2   : > { %1343 = vmatmul.msk.f32.vlgmr.msra.gmra.mxu2 %vm719_vm14, %v961_v32 }
 0x644   : > { %v1052_v34 = vpop.f32.mrf.mxu0 }
 0x645   : > { %1347 = vmatmul.msk.f32.vlgmr.msrb.gmra.mxu1 %vm719_vm14, %v1052_v34 }
 0x665   : > { %v985_v27 = vpop.f32.mrf.mxu2 }
 0x666   : > { %v988_v35 = vadd.f32 %v985_v27, %v897_v9 }
 0x6c2   : > { %v1076_v36 = vpop.f32.mrf.mxu1 }
 0x6c3   : > { %v1986_v37 = vadd.f32 %v1076_v36, %v988_v35 }
 0x6c5   : > { %v1082_v38 = vsel %vm522_vm0, %v1986_v37, 0.0  ;;  %v1132_v26 = vadd.f32 %v1449_v25, %v1986_v37 }
 0x6c6   : > { %1083 = vadd.xlane.f32.xlu0 %v1082_v38 }
 0x739   : > { %v1084_v39 = vpop.xlane.xlu0 %1083 }
 0x73a   : > { %v1085_v40 = vmul.f32 %v1084_v39, %v1871_v8 }
 0x73c   : > { %v1086_v41 = vsub.f32 %v1986_v37, %v1085_v40 }
 0x73e   : > { %v1087_v42 = vmul.f32 %v1086_v41, %v1086_v41  ;;  %v1107_v13 = vmul.f32 %v1446_v6, %v1086_v41 }
 0x740   : > { %v1088_v43 = vsel %vm522_vm0, %v1087_v42, 0.0 }
 0x741   : > { %1089 = vadd.xlane.f32.xlu2 %v1088_v43 }
 0x7b4   : > { %v1090_v48 = vpop.xlane.xlu2 %1089 }
 0x7b5   : > { %v1091_v49 = vmul.f32 0.032258064, %v1090_v48 }
 0x7b7   : > { %1476 = vrsqrt.f32 %v1091_v49  ;;  %vm1099_vm1 = vcmp.eq.f32.partialorder %v1091_v49, inf  ;;  %v1102_v60 = vand.u32 2147483648, %v1091_v49  ;;  %vm1101_vm2 = vcmp.eq.f32.partialorder %v1091_v49, 0.0 }
 0x7bd   : > { %v1477_v50 = vpop.eup %1476 }
 0x7be   : > { %v1093_v51 = vmul.f32 %v1477_v50, %v1091_v49 }
 0x7c0   : > { %v1094_v8 = vmul.f32 %v1477_v50, %v1093_v51 }
 0x7c2   : > { %v1095_v52 = vmul.f32 0.5, %v1094_v8 }
 0x7c4   : > { %v1096_v55 = vsub.f32 1.5, %v1095_v52 }
 0x7c6   : > { %v1097_v57 = vmul.f32 %v1477_v50, %v1096_v55 }
 0x7c8   : > { %v1098_v59 = vmul.f32 %v1097_v57, %v1091_v49 }
 0x7ca   : > { %v1100_v62 = vsel %vm1099_vm1, %v1091_v49, %v1098_v59 }
 0x7cb   : > { %v1103_v63 = vsel %vm1101_vm2, %v1102_v60, %v1100_v62 }
 0x7cc   : > { %v1108_v1 = vadd.f32 1e-06, %v1103_v63 }
 0x7ce   : > { %1478 = vrcp.f32 %v1108_v1  ;;  %v1120_v5 = vand.u32 2147483648, %v1108_v1  ;;  %v1118_v9 = vand.u32 2147483647, %v1108_v1  ;;  %vm1114_vm4 = vweird.f32 %v1108_v1 }
 0x7d0   : > { %v1121_v12 = vor.u32 1.1754944e-38, %v1120_v5  ;;  %vm1119_vm6 = vcmp.eq.f32.partialorder %v1118_v9, 8.507059e+37 }
 0x7d4   : > { %v1479_v2 = vpop.eup %1478 }
 0x7d5   : > { %v1110_v3 = vmul.f32 %v1479_v2, %v1108_v1  ;;  %vm1115_vm3 = vweird.f32 %v1479_v2 }
 0x7d6   : > { %vm1116_vm5 = vmor %vm1114_vm4, %vm1115_vm3 }
 0x7d7   : > { %v1111_v4 = vsub.f32 1.0, %v1110_v3 }
 0x7d9   : > { %v1112_v7 = vmul.f32 %v1479_v2, %v1111_v4 }
 0x7db   : > { %v1113_v10 = vadd.f32 %v1479_v2, %v1112_v7 }
 0x7dd   : > { %v1117_v14 = vsel %vm1116_vm5, %v1479_v2, %v1113_v10 }
 0x7de   : > { %v1122_v17 = vsel %vm1119_vm6, %v1121_v12, %v1117_v14 }
 0x7df   : > { %v1123_v11 = vmul.f32 %v1122_v17, %v1107_v13 }
 0x7e1   : > { %v1127_v18 = vadd.f32 %v1447_v15, %v1123_v11 }
 0x7e3   : > { %1348 = vmatmul.msk.f32.vlgmr.msrb.gmra.mxu2 %vm522_vm0, %v1127_v18 }
 0x866   : > { %v1161_v22 = vpop.f32.mrf.mxu2 }
 0x867   : > { %v1162_v23 = vadd.f32 %v1448_v21, %v1161_v22 }
 0x869   : > { %v1164_v24 = vmax.f32 %v1162_v23, 0.0 }
 0x86b   : > { %1349 = vmatmul.msk.f32.vlgmr.msrb.gmra.mxu3 %vm1173_vm7, %v1164_v24 }
 0x8ee   : > { %v1194_v16 = vpop.f32.mrf.mxu3 }
 0x8ef   : > { %v1197_v28 = vadd.f32 %v1194_v16, %v1132_v26 }
 0x8f1   : > { %1198 = vst.msk [vmem:[%s513_s23] sm:$0xff] %vm522_vm0, %v1197_v28 }
 0x8f2   : > { %1609 = shalt.err (!%p1606_p13)
}
 0x8f3   : > { %1364 = dma.vmem_to_hbm [thread:$0]  (%p1833_p0), %s1214_s27, 128, %s1216_s22, %s1200_s20  }
 0x8f4 PF: > { %s2111_s30 = sld [smem:[#allocation17_spill]]  ;;  %p1378_p2 = pnand %p1321_p6, %p1840_p5 }
 0x8f6   : > { %p1379_p4 = pneg %p1378_p2 }
 0x8fa   : > { %s1227_s7 = sand.u32 1, %s2111_s30  }
 0x8fb   : > { %s1228_s17 = scalar_lea.sflag [#allocation8], %s1227_s7 }
 0x8fc   : > { %1645 = dma.done.wait (%p1379_p4), %s1228_s17, 128  }
 0x8fd   : > { %1647 = vsyncadd (%p1379_p4), %s1228_s17, 4294967168  ;;  %s39_s21 = sadd.s32 1, %s1670_s21   ;;  %s2112_s15 = sld [smem:[#allocation18_spill]] }
 0x8fe   : > { %p36_p7 = scmp.ge.s32.totalorder %s39_s21, 4   ;;  %s2113_s17 = smov %s1654_s18 }
 0x8ff   : > { %s2114_s18 = smov %s1658_s19  ;;  %s2115_s19 = smov %s1838_s16 }
 0x900   : > { %s2116_s20 = smov %s1666_s0  ;;  %38 = sbr.rel (!%p36_p7) target bundleno = 17 (0x11), region = 130 }
 0x903   : > { %s2117_s0 = smov %s2112_s15 }
 0x905   :  { %1234 = vsyncpa [#allocation7], 1 }
 0x906   :  { %1236 = vsyncpa [#allocation7 + $0x1], 1 }
 0x907   :  { %1237 = vsyncpa [#allocation10], 1 }
 0x908   :  { %1238 = vsyncpa [#allocation8], 1 }
 0x909   :  { %1240 = vsyncpa [#allocation8 + $0x1], 1 }

</bundles_post_ra>
